<compile_context>
chip_gen: v7x
topology: tpu7x:2x2x1
jax: 0.10.0
libtpu: 0.0.40
codegen_flags: <defaults>
</compile_context>

<pallas_src>
import jax
import jax.numpy as jnp
from jax import lax
from jax.experimental import pallas as pl
from jax.experimental.pallas import tpu as pltpu

_LANE = 128


def _critic_kernel(x_ref, w1_ref, b1_ref, w2_ref, b2_ref, w3_ref, b3_ref, out_ref):
    cdt = w1_ref.dtype                      # MXU operand dtype (bf16 default, or f32)
    x = x_ref[...].astype(cdt)              # (bt, S) -- batch-major, straight from HBM

    # Layer 1: contract the feature axis of both operands:
    #   (128, S) . (bt, S)^T -> (128, bt), f32 accumulate.
    # The transposed-operand matmul keeps the transpose inside the kernel
    # (no wrapper-side state.T pass over HBM).
    h1 = lax.dot_general(
        w1_ref[...], x,
        dimension_numbers=(((1,), (1,)), ((), ())),
        preferred_element_type=jnp.float32) + b1_ref[...]
    h1 = jnp.maximum(h1, 0.0)

    # Layer 2 on the MXU: (256, 128) @ (128, bt) -> (256, bt), f32 accumulate.
    h2 = jnp.dot(w2_ref[...], h1.astype(cdt),
                 preferred_element_type=jnp.float32) + b2_ref[...]
    h2 = jnp.maximum(h2, 0.0)

    # Layer 3 (256 -> 1): an N=1 matmul would waste a full MXU pass, so do a
    # VPU multiply + sublane (XLU) reduction instead -> (1, bt), lane dense.
    # NOTE: reductions are over the FEATURE axis only.  Out-of-bounds batch
    # lanes of a partial edge block may hold garbage; they never mix across
    # the batch axis and are dropped on the (partial) output store / sliced
    # away by the wrapper -- do not add a batch-axis reduction here.
    v = jnp.sum(h2 * w3_ref[...], axis=0, keepdims=True) + b3_ref[...]
    out_ref[...] = v.astype(out_ref.dtype)


def _pick_batch_tile(B, max_tile=2048):
    """Lane-aligned (multiple of 128) batch tile.

    * as large as possible (up to `max_tile`) to amortize the ~0.35 us
      per-grid-step overhead and the resident-weight DMAs,
    * capped at 2048 (~ a few MiB of double-buffered inputs + f32
      intermediates) so it fits v5e's 16 MiB scoped VMEM default and leaves
      headroom on v7x's 32 MiB scoped / 64 MiB physical VMEM,
    * split so the grid has >= 2 steps whenever B spans >= 2 lane groups, so
      the "parallel" batch axis can shard across v7x's two TensorCores.
    """
    b_lanes = ((max(B, 1) + _LANE - 1) // _LANE) * _LANE   # B rounded up to 128
    if b_lanes <= _LANE:
        return _LANE
    if b_lanes <= max_tile:
        half = ((b_lanes // 2 + _LANE - 1) // _LANE) * _LANE
        return max(_LANE, half)
    return max_tile


def critic_forward(state, params, *, batch_tile=None, use_bf16_mxu=True,
                   max_batch_tile=2048):
    """state: (B, state_size) f32. params in PyTorch nn.Linear layout.

    use_bf16_mxu=True (default) runs MXU operands in bf16 with f32
    accumulation (looser numerics, ~1e-2 abs error for O(1) activations);
    use_bf16_mxu=False reproduces PyTorch f32 semantics exactly.
    """
    B, S = state.shape
    w1, b1 = params["w1"], params["b1"]     # (128, S), (128,)
    w2, b2 = params["w2"], params["b2"]     # (256, 128), (256,)
    w3, b3 = params["w3"], params["b3"]     # (1, 256), (1,)

    mxu_dtype = jnp.bfloat16 if use_bf16_mxu else jnp.float32
    w1k = w1.astype(mxu_dtype)                       # MXU operands
    w2k = w2.astype(mxu_dtype)
    b1c = b1.reshape(128, 1).astype(jnp.float32)     # column biases (lane broadcast)
    b2c = b2.reshape(256, 1).astype(jnp.float32)
    w3c = w3.reshape(256, 1).astype(jnp.float32)     # column for the VPU reduce
    b3c = b3.reshape(1, 1).astype(jnp.float32)

    bt = batch_tile if batch_tile is not None else _pick_batch_tile(B, max_batch_tile)
    grid = (pl.cdiv(B, bt),)

    # Advisory cost hint so XLA can overlap this small call with neighbors.
    weight_bytes = (128 * S + 128 + 256 * 128 + 256 + 256 + 1) * 4
    cost = pl.CostEstimate(
        flops=2 * B * (S * 128 + 128 * 256 + 256),
        transcendentals=0,
        bytes_accessed=B * S * 4 + B * 4 + weight_bytes,
    )

    out = pl.pallas_call(
        _critic_kernel,
        out_shape=jax.ShapeDtypeStruct((1, B), jnp.float32),
        grid_spec=pltpu.PrefetchScalarGridSpec(
            num_scalar_prefetch=0,
            grid=grid,
            in_specs=[
                pl.BlockSpec((bt, S), lambda i: (i, 0)),    # state tile (per step)
                pl.BlockSpec(w1k.shape, lambda i: (0, 0)),  # w1 (resident)
                pl.BlockSpec(b1c.shape, lambda i: (0, 0)),  # b1
                pl.BlockSpec(w2k.shape, lambda i: (0, 0)),  # w2 (resident)
                pl.BlockSpec(b2c.shape, lambda i: (0, 0)),  # b2
                pl.BlockSpec(w3c.shape, lambda i: (0, 0)),  # w3 column
                pl.BlockSpec(b3c.shape, lambda i: (0, 0)),  # b3
            ],
            out_specs=pl.BlockSpec((1, bt), lambda i: (0, i)),
        ),
        compiler_params=pltpu.CompilerParams(
            dimension_semantics=("parallel",),
        ),
        cost_estimate=cost,
    )(state, w1k, b1c, w2k, b2c, w3c, b3c)

    return out[0, :].reshape(B, 1)


def init_params(key, state_size):
    """Deterministic init mimicking nn.Linear (uniform +/- 1/sqrt(fan_in)),
    stored in PyTorch's (out_features, in_features) weight layout."""
    def linear_init(k, fan_in, fan_out):
        kw, kb = jax.random.split(k)
        bound = 1.0 / (fan_in ** 0.5)
        w = jax.random.uniform(kw, (fan_out, fan_in), jnp.float32, -bound, bound)
        b = jax.random.uniform(kb, (fan_out,), jnp.float32, -bound, bound)
        return w, b

    k1, k2, k3 = jax.random.split(key, 3)
    w1, b1 = linear_init(k1, state_size, 128)
    w2, b2 = linear_init(k2, 128, 256)
    w3, b3 = linear_init(k3, 256, 1)
    return {"w1": w1, "b1": b1, "w2": w2, "b2": b2, "w3": w3, "b3": b3}


def critic_ref(state, p):
    """Pure-JAX reference (mirrors the PyTorch forward exactly)."""
    h1 = jnp.maximum(state @ p["w1"].T + p["b1"], 0.0)
    h2 = jnp.maximum(h1 @ p["w2"].T + p["b2"], 0.0)
    return h2 @ p["w3"].T + p["b3"]


if __name__ == "__main__":
    key = jax.random.PRNGKey(0)
    k_params, k_state = jax.random.split(key)

    batch = 256            # small demo batch; any B works (adaptive tiling)
    state_size = 32
    params = init_params(k_params, state_size)
    state = jax.random.normal(k_state, (batch, state_size), jnp.float32)

    expected = critic_ref(state, params)

    # f32 MXU path: exact PyTorch semantics, tight tolerance.
    value_f32 = jax.block_until_ready(
        critic_forward(state, params, use_bf16_mxu=False))
    assert value_f32.shape == (batch, 1)
    assert jnp.allclose(value_f32, expected, atol=1e-4, rtol=1e-4), \
        "f32 mismatch vs reference"

    # Default path: bf16 MXU operands with f32 accumulation (looser tolerance,
    # acceptable for an RL critic per the performance review).
    value_bf16 = jax.block_until_ready(critic_forward(state, params))
    assert value_bf16.shape == (batch, 1)
    assert jnp.allclose(value_bf16, expected, atol=1e-1, rtol=1e-1), \
        "bf16 mismatch vs reference"

    # Ragged batch (not a multiple of the lane tile): exercises the partial
    # edge block with no wrapper-side padding pass.
    ragged = 200
    value_r = jax.block_until_ready(
        critic_forward(state[:ragged], params, use_bf16_mxu=False))
    assert value_r.shape == (ragged, 1)
    assert jnp.allclose(value_r, expected[:ragged], atol=1e-4, rtol=1e-4), \
        "ragged-batch mismatch vs reference"

    print("KERNEL_OK")
</pallas_src>

<mosaic_0001>
module attributes {stable_mosaic.version = 11 : i64} {
  func.func @_critic_kernel(%arg0: i32, %arg1: memref<128x32xf32, #tpu.memory_space<vmem>>, %arg2: memref<128x32xf32, #tpu.memory_space<vmem>>, %arg3: memref<128x1xf32, #tpu.memory_space<vmem>>, %arg4: memref<256x128xf32, #tpu.memory_space<vmem>>, %arg5: memref<256x1xf32, #tpu.memory_space<vmem>>, %arg6: memref<256x1xf32, #tpu.memory_space<vmem>>, %arg7: memref<1x1xf32, #tpu.memory_space<vmem>>, %arg8: memref<1x128xf32, #tpu.memory_space<vmem>>) attributes {dimension_semantics = [#tpu.dimension_semantics<parallel>], iteration_bounds = array<i64: 2>, scalar_prefetch = 0 : i64, scratch_operands = 0 : i64, tpu.core_type = #tpu.core_type<tc>, window_params = [{transform_indices = @transform_0, window_bounds = array<i64: 128, 32>}, {pipeline_mode = #tpu.pipeline_mode<synchronous>, transform_indices = @transform_1, window_bounds = array<i64: 128, 32>}, {pipeline_mode = #tpu.pipeline_mode<synchronous>, transform_indices = @transform_2, window_bounds = array<i64: 128, 1>}, {pipeline_mode = #tpu.pipeline_mode<synchronous>, transform_indices = @transform_3, window_bounds = array<i64: 256, 128>}, {pipeline_mode = #tpu.pipeline_mode<synchronous>, transform_indices = @transform_4, window_bounds = array<i64: 256, 1>}, {pipeline_mode = #tpu.pipeline_mode<synchronous>, transform_indices = @transform_5, window_bounds = array<i64: 256, 1>}, {pipeline_mode = #tpu.pipeline_mode<synchronous>, transform_indices = @transform_6, window_bounds = array<i64: 1, 1>}, {transform_indices = @transform_7, window_bounds = array<i64: 1, 128>}]} {
    %c0 = arith.constant 0 : index
    %c0_0 = arith.constant 0 : index
    %0 = vector.load %arg1[%c0, %c0_0] : memref<128x32xf32, #tpu.memory_space<vmem>>, vector<128x32xf32>
    %c0_1 = arith.constant 0 : index
    %c0_2 = arith.constant 0 : index
    %1 = vector.load %arg2[%c0_1, %c0_2] : memref<128x32xf32, #tpu.memory_space<vmem>>, vector<128x32xf32>
    %cst = arith.constant dense<0.000000e+00> : vector<128x128xf32>
    %2 = tpu.matmul %1, %0, %cst {dimension_numbers = #tpu.dot_dimension_numbers<[1], [1], [0], [0], [0, 0, 1, 0], [], []>} : vector<128x32xf32>, vector<128x32xf32>, vector<128x128xf32> -> vector<128x128xf32>
    %c0_3 = arith.constant 0 : index
    %c0_4 = arith.constant 0 : index
    %3 = vector.load %arg3[%c0_3, %c0_4] : memref<128x1xf32, #tpu.memory_space<vmem>>, vector<128x1xf32>
    %4 = vector.broadcast %3 : vector<128x1xf32> to vector<128x128xf32>
    %5 = arith.addf %2, %4 : vector<128x128xf32>
    %cst_5 = arith.constant 0.000000e+00 : f32
    %6 = vector.broadcast %cst_5 : f32 to vector<128x128xf32>
    %7 = arith.maximumf %5, %6 : vector<128x128xf32>
    %c0_6 = arith.constant 0 : index
    %c0_7 = arith.constant 0 : index
    %8 = vector.load %arg4[%c0_6, %c0_7] : memref<256x128xf32, #tpu.memory_space<vmem>>, vector<256x128xf32>
    %cst_8 = arith.constant dense<0.000000e+00> : vector<256x128xf32>
    %9 = tpu.matmul %8, %7, %cst_8 {dimension_numbers = #tpu.dot_dimension_numbers<[1], [0], [0], [1], [0, 0, 1, 1], [], []>} : vector<256x128xf32>, vector<128x128xf32>, vector<256x128xf32> -> vector<256x128xf32>
    %c0_9 = arith.constant 0 : index
    %c0_10 = arith.constant 0 : index
    %10 = vector.load %arg5[%c0_9, %c0_10] : memref<256x1xf32, #tpu.memory_space<vmem>>, vector<256x1xf32>
    %11 = vector.broadcast %10 : vector<256x1xf32> to vector<256x128xf32>
    %12 = arith.addf %9, %11 : vector<256x128xf32>
    %cst_11 = arith.constant 0.000000e+00 : f32
    %13 = vector.broadcast %cst_11 : f32 to vector<256x128xf32>
    %14 = arith.maximumf %12, %13 : vector<256x128xf32>
    %c0_12 = arith.constant 0 : index
    %c0_13 = arith.constant 0 : index
    %15 = vector.load %arg6[%c0_12, %c0_13] : memref<256x1xf32, #tpu.memory_space<vmem>>, vector<256x1xf32>
    %16 = vector.broadcast %15 : vector<256x1xf32> to vector<256x128xf32>
    %17 = arith.mulf %14, %16 : vector<256x128xf32>
    %cst_14 = arith.constant dense<0.000000e+00> : vector<128xf32>
    %18 = vector.multi_reduction <add>, %17, %cst_14 [0] : vector<256x128xf32> to vector<128xf32>
    %19 = vector.shape_cast %18 : vector<128xf32> to vector<1x128xf32>
    %c0_15 = arith.constant 0 : index
    %c0_16 = arith.constant 0 : index
    %20 = vector.load %arg7[%c0_15, %c0_16] : memref<1x1xf32, #tpu.memory_space<vmem>>, vector<1x1xf32>
    %21 = vector.broadcast %20 : vector<1x1xf32> to vector<1x128xf32>
    %22 = arith.addf %19, %21 : vector<1x128xf32>
    %c0_17 = arith.constant 0 : index
    %c0_18 = arith.constant 0 : index
    %23 = vector.load %arg8[%c0_17, %c0_18] : memref<1x128xf32, #tpu.memory_space<vmem>>, vector<1x128xf32>
    tpu.vector_store %arg8[%c0_17, %c0_18], %22 {strides = array<i32>} : memref<1x128xf32, #tpu.memory_space<vmem>>, vector<1x128xf32>,
    return
  }
  func.func @transform_0(%arg0: i32) -> (i32, i32) {
    %c0_i32 = arith.constant 0 : i32
    %c0_i32_0 = arith.constant 0 : i32
    return %arg0, %c0_i32 : i32, i32
  }
  func.func @transform_1(%arg0: i32) -> (i32, i32) {
    %c0_i32 = arith.constant 0 : i32
    %c0_i32_0 = arith.constant 0 : i32
    %c0_i32_1 = arith.constant 0 : i32
    return %c0_i32, %c0_i32_0 : i32, i32
  }
  func.func @transform_2(%arg0: i32) -> (i32, i32) {
    %c0_i32 = arith.constant 0 : i32
    %c0_i32_0 = arith.constant 0 : i32
    %c0_i32_1 = arith.constant 0 : i32
    return %c0_i32, %c0_i32_0 : i32, i32
  }
  func.func @transform_3(%arg0: i32) -> (i32, i32) {
    %c0_i32 = arith.constant 0 : i32
    %c0_i32_0 = arith.constant 0 : i32
    %c0_i32_1 = arith.constant 0 : i32
    return %c0_i32, %c0_i32_0 : i32, i32
  }
  func.func @transform_4(%arg0: i32) -> (i32, i32) {
    %c0_i32 = arith.constant 0 : i32
    %c0_i32_0 = arith.constant 0 : i32
    %c0_i32_1 = arith.constant 0 : i32
    return %c0_i32, %c0_i32_0 : i32, i32
  }
  func.func @transform_5(%arg0: i32) -> (i32, i32) {
    %c0_i32 = arith.constant 0 : i32
    %c0_i32_0 = arith.constant 0 : i32
    %c0_i32_1 = arith.constant 0 : i32
    return %c0_i32, %c0_i32_0 : i32, i32
  }
  func.func @transform_6(%arg0: i32) -> (i32, i32) {
    %c0_i32 = arith.constant 0 : i32
    %c0_i32_0 = arith.constant 0 : i32
    %c0_i32_1 = arith.constant 0 : i32
    return %c0_i32, %c0_i32_0 : i32, i32
  }
  func.func @transform_7(%arg0: i32) -> (i32, i32) {
    %c0_i32 = arith.constant 0 : i32
    %c0_i32_0 = arith.constant 0 : i32
    return %c0_i32, %arg0 : i32, i32
  }
}

</mosaic_0001>

<bundles_post_ra>
// kernel: tpu_custom_call.1
= control target key start
LH: loop header
LB: loop body
LE: loop exit
PB: predicated region body
PF: predicated region fallthrough
CT: control target
= control target key end

     0   :  { %s2627_s0 = inlined_call_operand.vmem [shape: f32[256,32], index: 0, kind: input, shape index: {}]   ;;  %s2628_s1 = inlined_call_operand.vmem [shape: f32[128,32], index: 1, kind: input, shape index: {}]   ;;  %s2629_s2 = inlined_call_operand.vmem [shape: f32[128,1], index: 2, kind: input, shape index: {}]   ;;  %s2630_s3 = inlined_call_operand.vmem [shape: f32[256,128], index: 3, kind: input, shape index: {}]   ;;  %s2631_s4 = inlined_call_operand.vmem [shape: f32[256,1], index: 4, kind: input, shape index: {}]   ;;  %s2632_s5 = inlined_call_operand.vmem [shape: f32[256,1], index: 5, kind: input, shape index: {}]   ;;  %s2633_s6 = inlined_call_operand.<no memory space> [shape: f32[1,1], index: 6, kind: input, shape index: {}]   ;;  %s2634_s7 = inlined_call_operand.hbm [shape: f32[1,256], index: 7, kind: output, shape index: {}]  }
   0x1   :  { %v12_v0 = vstv %s2633_s6 }
   0x2   :  { %13 = vst [vmem:[#allocation2] sm:$0x1] %v12_v0 }
   0x3   :  { %14 = vsyncpa [#allocation4], 0 }
   0x4   :  { %16 = vsyncpa [#allocation4 + $0x1], 0  ;;  %s1976_s26 = smov 0   ;;  %s1978_s27 = smov 0  }
   0x5   :  { %s1980_s28 = smov 0   ;;  %s1982_s29 = smov 0  }
   0x6 LB: > { %s1487_s6 = sadd.s32 4294967295, %s1929_s29   ;;  %s1488_s30 = sadd.s32 4294967294, %s1929_s29   ;;  %s1929_s29 = sphi %s1982_s29, %s2642_s29   ;;  %s1925_s28 = sphi %s1980_s28, %s2641_s28   ;;  %s1921_s27 = sphi %s1978_s27, %s2640_s27   ;;  %s1917_s26 = sphi %s1976_s26, %s2639_s26  }
   0x7   : > { %s1999_s8 = sadd.s32 1, %s1929_s29   ;;  %s181_s9 = sadd.s32 1, %s1925_s28 }
   0x8   : > { %s178_s10 = ssub.s32 %s1929_s29, %s1999_s8  ;;  %p191_p0 = scmp.ne.s32.totalorder %s1925_s28, %s1921_s27 }
   0x9   : > { %p179_p1 = scmp.eq.s32.totalorder %s178_s10, 0  ;;  %p192_p2 = scmp.eq.s32.totalorder %s1487_s6, 1 }
   0xa   : > { %p197_p3 = scmp.ne.s32.totalorder %s1921_s27, %s1917_s26  ;;  %p198_p4 = scmp.eq.s32.totalorder %s1488_s30, 1 }
   0xb   : > { %s2009_s11 = scalar_select %p179_p1, %s1925_s28, %s181_s9  }
   0xc   : > { %p2011_p5 = por %p192_p2, %p191_p0  ;;  %p2015_p6 = por %p198_p4, %p197_p3 }
   0xd   : > { %p1491_p7 = scmp.ge.s32.totalorder %s1929_s29, 1  ;;  %p243_p8 = scmp.lt.s32.totalorder %s1929_s29, 3 }
   0xf   : > { %p244_p9 = pnand %p1491_p7, %p243_p8 }
  0x10   : > { %v312_v1 = vld [vmem:[%s2629_s2] sm:$0xff] (!%p244_p9)  ;;  %v314_v2 = vld [vmem:[%s2629_s2 + $0x10] sm:$0xff] (!%p244_p9)  ;;  %s2027_s18 = sshll.u32 (!%p244_p9), %s1487_s6, 4  ;;  %v1931_v3 = vmov (!%p244_p9), 0   ;;  %v313_v4 = vld [vmem:[%s2629_s2 + $0x8] sm:$0xff] (!%p244_p9)  ;;  %vm408_vm0 = vcmask (!%p244_p9), 261120  }
  0x11   : > { %247 = sbr.rel (%p244_p9) target bundleno = 657 (0x291), region = 48  ;;  %1865 = vset.pattern.permute.xlu0 (!%p244_p9), %v1931_v3  ;;  %1866 = vset.pattern.permute.xlu1 (!%p244_p9), %v1931_v3  ;;  %p275_p10 = scmp.lt.s32.totalorder (!%p244_p9), %s2027_s18, 31  ;;  %v315_v5 = vld [vmem:[%s2629_s2 + $0x18] sm:$0xff] (!%p244_p9)  ;;  %v316_v6 = vld [vmem:[%s2629_s2 + $0x20] sm:$0xff] (!%p244_p9)  ;;  %vm2047_vm1 = vmpackc.low (!%p244_p9), %vm408_vm0, %vm408_vm0 }
  0x12   : > { %330 = vperm.xlu0 (!%p244_p9), %1865, %v312_v1   ;;  %340 = vperm.xlu1 (!%p244_p9), %1866, %v314_v2   ;;  %v317_v12 = vld [vmem:[%s2629_s2 + $0x28] sm:$0xff] (!%p244_p9)  ;;  %v318_v15 = vld [vmem:[%s2629_s2 + $0x30] sm:$0xff] (!%p244_p9)  ;;  %v319_v16 = vld [vmem:[%s2629_s2 + $0x38] sm:$0xff] (!%p244_p9)  ;;  %s2585_s9 = scalar_lea.hbm (!%p244_p9), %s2634_s7, %s2027_s18  ;;  %s1932_s16 = smov (!%p244_p9), [#allocation3]  }
  0x13   : > { %v320_v19 = vld [vmem:[%s2629_s2 + $0x40] sm:$0xff] (!%p244_p9)  ;;  %v321_v20 = vld [vmem:[%s2629_s2 + $0x48] sm:$0xff] (!%p244_p9)  ;;  %v322_v23 = vld [vmem:[%s2629_s2 + $0x50] sm:$0xff] (!%p244_p9)  ;;  %s1871_s17 = sshll.u32 (!%p244_p9), %s1932_s16, 4  ;;  %s1872_s17 = int_to_ptr.vmem [resolvable:$false] %s1871_s17 }
  0x14   : > { %v296_v22 = vld [vmem:[%s2628_s1] sm:$0xff] (!%p244_p9)  ;;  %v323_v24 = vld [vmem:[%s2629_s2 + $0x58] sm:$0xff] (!%p244_p9)  ;;  %v325_v28 = vld [vmem:[%s2629_s2 + $0x68] sm:$0xff] (!%p244_p9)  ;;  %s1873_s19 = scalar_lea.vmem (!%p244_p9), %s1872_s17, 32 }
  0x15   : > { %1641 = vmatprep.mubr.msk.f32.mxu0 (!%p244_p9), %vm408_vm0, %v296_v22  ;;  %v324_v27 = vld [vmem:[%s2629_s2 + $0x60] sm:$0xff] (!%p244_p9)  ;;  %v326_v30 = vld [vmem:[%s2629_s2 + $0x70] sm:$0xff] (!%p244_p9)  ;;  %v327_v31 = vld [vmem:[%s2629_s2 + $0x78] sm:$0xff] (!%p244_p9) }
  0x16   : > { %335 = vperm.xlu0 (!%p244_p9), %1865, %v313_v4   ;;  %345 = vperm.xlu1 (!%p244_p9), %1866, %v315_v5   ;;  %v698_v34 = vld [vmem:[%s2631_s4] sm:$0xff] (!%p244_p9)  ;;  %v699_v35 = vld [vmem:[%s2631_s4 + $0x8] sm:$0xff] (!%p244_p9)  ;;  %v700_v37 = vld [vmem:[%s2631_s4 + $0x10] sm:$0xff] (!%p244_p9) }
  0x17   : > { %v701_v38 = vld [vmem:[%s2631_s4 + $0x18] sm:$0xff] (!%p244_p9)  ;;  %v702_v41 = vld [vmem:[%s2631_s4 + $0x20] sm:$0xff] (!%p244_p9)  ;;  %v703_v42 = vld [vmem:[%s2631_s4 + $0x28] sm:$0xff] (!%p244_p9) }
  0x18   : > { %s276_s23 = scalar_select %p275_p10, %s2027_s18, 31  ;;  %v704_v44 = vld [vmem:[%s2631_s4 + $0x30] sm:$0xff]  ;;  %v705_v45 = vld [vmem:[%s2631_s4 + $0x38] sm:$0xff]  ;;  %v706_v48 = vld [vmem:[%s2631_s4 + $0x40] sm:$0xff] }
  0x19   : > { %v707_v49 = vld [vmem:[%s2631_s4 + $0x48] sm:$0xff]  ;;  %v708_v51 = vld [vmem:[%s2631_s4 + $0x50] sm:$0xff]  ;;  %v709_v52 = vld [vmem:[%s2631_s4 + $0x58] sm:$0xff] }
  0x1a   : > { %s1493_s24 = sshll.u32 %s276_s23, 3  ;;  %350 = vperm.xlu0 %1865, %v316_v6   ;;  %355 = vperm.xlu1 %1866, %v317_v12   ;;  %v710_v55 = vld [vmem:[%s2631_s4 + $0x60] sm:$0xff]  ;;  %v711_v56 = vld [vmem:[%s2631_s4 + $0x68] sm:$0xff]  ;;  %v712_v58 = vld [vmem:[%s2631_s4 + $0x70] sm:$0xff] }
  0x1b   : > { %s2043_s10 = scalar_lea.vmem %s2627_s0, %s1493_s24  ;;  %v713_v59 = vld [vmem:[%s2631_s4 + $0x78] sm:$0xff]  ;;  %v714_v60 = vld [vmem:[%s2631_s4 + $0x80] sm:$0xff]  ;;  %v715_v61 = vld [vmem:[%s2631_s4 + $0x88] sm:$0xff]  ;;  %s272_s24 = sand.u32 1, %s1921_s27  }
  0x1c   : > { %v280_v8 = vld [vmem:[%s2043_s10] sm:$0xff]  ;;  %v281_v9 = vld [vmem:[%s2043_s10 + $0x8] sm:$0xff]  ;;  %v282_v10 = vld [vmem:[%s2043_s10 + $0x10] sm:$0xff]  ;;  %s273_s25 = scalar_lea.vmem [#allocation3], %s272_s24  ;;  %s1421_s14 = scalar_lea.sflag [#allocation4], %s272_s24 }
  0x1d   : > { %v1745_v11 = vpack.c.bf16 %v281_v9, %v280_v8  ;;  %v283_v13 = vld [vmem:[%s2043_s10 + $0x18] sm:$0xff]  ;;  %v284_v17 = vld [vmem:[%s2043_s10 + $0x20] sm:$0xff]  ;;  %v285_v18 = vld [vmem:[%s2043_s10 + $0x28] sm:$0xff]  ;;  %s1433_s6 = sshll.u32 %s273_s25, 4  ;;  %s2587_s6 = int_to_ptr.vmem [resolvable:$true] %s1433_s6 }
  0x1e   : > { %v1751_v14 = vpack.c.bf16 %v283_v13, %v282_v10  ;;  %360 = vperm.xlu0 %1865, %v318_v15   ;;  %365 = vperm.xlu1 %1866, %v319_v16   ;;  %v1757_v21 = vpack.c.bf16 %v285_v18, %v284_v17  ;;  %v286_v25 = vld [vmem:[%s2043_s10 + $0x30] sm:$0xff]  ;;  %v287_v26 = vld [vmem:[%s2043_s10 + $0x38] sm:$0xff]  ;;  %v288_v32 = vld [vmem:[%s2043_s10 + $0x40] sm:$0xff]  ;;  %s1867_s15 = scalar_lea.vmem %s2587_s6, 16  ;;  %p1874_p0 = scmp.lt.s32.totalorder %s2587_s6, %s1872_s17 }
  0x1f   : > { %1747 = vmatprep.subr.msk.bf16.mxu0 %vm2047_vm1, %v1745_v11  ;;  %v1763_v29 = vpack.c.bf16 %v287_v26, %v286_v25  ;;  %v289_v33 = vld [vmem:[%s2043_s10 + $0x48] sm:$0xff]  ;;  %v290_v39 = vld [vmem:[%s2043_s10 + $0x50] sm:$0xff]  ;;  %v291_v40 = vld [vmem:[%s2043_s10 + $0x58] sm:$0xff]  ;;  %p1868_p11 = scmp.ne.s32.totalorder %s2587_s6, %s1867_s15  ;;  %p1875_p1 = scmp.lt.s32.totalorder %s1873_s19, %s1867_s15 }
  0x20   : > { %1750 = vmatpush3.bf16.xpose.msk.msra.mxu0 %vm2047_vm1, %v1745_v11  ;;  %v1769_v36 = vpack.c.bf16 %v289_v33, %v288_v32  ;;  %v1775_v43 = vpack.c.bf16 %v291_v40, %v290_v39  ;;  %v292_v46 = vld [vmem:[%s2043_s10 + $0x60] sm:$0xff]  ;;  %v293_v47 = vld [vmem:[%s2043_s10 + $0x68] sm:$0xff]  ;;  %v294_v53 = vld [vmem:[%s2043_s10 + $0x70] sm:$0xff] }
  0x21   : > { %1753 = vmatprep.subr.msk.bf16.mxu0 %vm2047_vm1, %v1751_v14  ;;  %v1781_v50 = vpack.c.bf16 %v293_v47, %v292_v46  ;;  %v295_v54 = vld [vmem:[%s2043_s10 + $0x78] sm:$0xff]  ;;  %v716_v62 = vld [vmem:[%s2631_s4 + $0x90] sm:$0xff]  ;;  %v718_v0 = vld [vmem:[%s2631_s4 + $0xa0] sm:$0xff]  ;;  %p1869_p12 = pnand %p1868_p11, %p2011_p5  ;;  %p1876_p2 = por %p1875_p1, %p1874_p0 }
  0x22   : > { %370 = vperm.xlu0 %1865, %v320_v19   ;;  %375 = vperm.xlu1 %1866, %v321_v20   ;;  %v1787_v57 = vpack.c.bf16 %v295_v54, %v294_v53  ;;  %v717_v63 = vld [vmem:[%s2631_s4 + $0x98] sm:$0xff]  ;;  %v297_v1 = vld [vmem:[%s2628_s1 + $0x8] sm:$0xff]  ;;  %v298_v3 = vld [vmem:[%s2628_s1 + $0x10] sm:$0xff] }
  0x23   : > { %v719_v2 = vld [vmem:[%s2631_s4 + $0xa8] sm:$0xff]  ;;  %v720_v4 = vld [vmem:[%s2631_s4 + $0xb0] sm:$0xff]  ;;  %v299_v5 = vld [vmem:[%s2628_s1 + $0x18] sm:$0xff]  ;;  %p1870_p13 = pneg %p1869_p12 }
  0x24   : > { %v721_v6 = vld [vmem:[%s2631_s4 + $0xb8] sm:$0xff]  ;;  %v300_v7 = vld [vmem:[%s2628_s1 + $0x20] sm:$0xff]  ;;  %v301_v9 = vld [vmem:[%s2628_s1 + $0x28] sm:$0xff] }
  0x25   : > { %v722_v8 = vld [vmem:[%s2631_s4 + $0xc0] sm:$0xff]  ;;  %v723_v10 = vld [vmem:[%s2631_s4 + $0xc8] sm:$0xff]  ;;  %v302_v11 = vld [vmem:[%s2628_s1 + $0x30] sm:$0xff]  ;;  %p1877_p3 = pnand %p1876_p2, %p1870_p13 }
  0x26   : > { %380 = vperm.xlu0 %1865, %v322_v23   ;;  %385 = vperm.xlu1 %1866, %v323_v24   ;;  %v724_v12 = vld [vmem:[%s2631_s4 + $0xd0] sm:$0xff]  ;;  %v303_v13 = vld [vmem:[%s2628_s1 + $0x38] sm:$0xff]  ;;  %v304_v15 = vld [vmem:[%s2628_s1 + $0x40] sm:$0xff] }
  0x27   : > { %v726_v16 = vld [vmem:[%s2631_s4 + $0xe0] sm:$0xff]  ;;  %v305_v17 = vld [vmem:[%s2628_s1 + $0x48] sm:$0xff]  ;;  %v306_v19 = vld [vmem:[%s2628_s1 + $0x50] sm:$0xff] }
  0x28   : > { %1756 = vmatpush3.bf16.xpose.msk.msra.mxu0 %vm2047_vm1, %v1751_v14  ;;  %v725_v14 = vld [vmem:[%s2631_s4 + $0xd8] sm:$0xff]  ;;  %v1147_v18 = vld [vmem:[%s2632_s5] sm:$0xff]  ;;  %v1148_v20 = vld [vmem:[%s2632_s5 + $0x8] sm:$0xff] }
  0x29   : > { %1759 = vmatprep.subr.msk.bf16.mxu0 %vm2047_vm1, %v1757_v21  ;;  %v1149_v22 = vld [vmem:[%s2632_s5 + $0x10] sm:$0xff]  ;;  %v308_v23 = vld [vmem:[%s2628_s1 + $0x60] sm:$0xff]  ;;  %v1150_v24 = vld [vmem:[%s2632_s5 + $0x18] sm:$0xff] }
  0x2a   : > { %390 = vperm.xlu0 %1865, %v324_v27   ;;  %395 = vperm.xlu1 %1866, %v325_v28   ;;  %v309_v25 = vld [vmem:[%s2628_s1 + $0x68] sm:$0xff]  ;;  %v1151_v26 = vld [vmem:[%s2632_s5 + $0x20] sm:$0xff]  ;;  %v310_v27 = vld [vmem:[%s2628_s1 + $0x70] sm:$0xff] }
  0x2b   : > { %v1152_v28 = vld [vmem:[%s2632_s5 + $0x28] sm:$0xff]  ;;  %v1155_v32 = vld [vmem:[%s2632_s5 + $0x40] sm:$0xff]  ;;  %v1162_v39 = vld [vmem:[%s2632_s5 + $0x78] sm:$0xff] }
  0x2c   : > { %v1156_v33 = vld [vmem:[%s2632_s5 + $0x48] sm:$0xff]  ;;  %v1163_v40 = vld [vmem:[%s2632_s5 + $0x80] sm:$0xff]  ;;  %v1169_v46 = vld [vmem:[%s2632_s5 + $0xb0] sm:$0xff] }
  0x2d   : > { %v1170_v47 = vld [vmem:[%s2632_s5 + $0xb8] sm:$0xff]  ;;  %v728_v53 = vld [vmem:[%s2631_s4 + $0xf0] sm:$0xff]  ;;  %v1175_v54 = vld [vmem:[%s2632_s5 + $0xe0] sm:$0xff] }
  0x2e   : > { %400 = vperm.xlu0 %1865, %v326_v30   ;;  %405 = vperm.xlu1 %1866, %v327_v31   ;;  %v1153_v30 = vld [vmem:[%s2632_s5 + $0x30] sm:$0xff]  ;;  %v1154_v31 = vld [vmem:[%s2632_s5 + $0x38] sm:$0xff] }
  0x30   : > { %1762 = vmatpush3.bf16.xpose.msk.msra.mxu0 %vm2047_vm1, %v1757_v21  ;;  %v307_v21 = vld [vmem:[%s2628_s1 + $0x58] sm:$0xff] }
  0x31   : > { %1765 = vmatprep.subr.msk.bf16.mxu0 %vm2047_vm1, %v1763_v29 }
  0x32   : > { %732 = vperm.xlu0 %1865, %v698_v34   ;;  %737 = vperm.xlu1 %1866, %v699_v35   ;;  %v1157_v34 = vld [vmem:[%s2632_s5 + $0x50] sm:$0xff]  ;;  %v1158_v35 = vld [vmem:[%s2632_s5 + $0x58] sm:$0xff] }
  0x36   : > { %742 = vperm.xlu0 %1865, %v700_v37   ;;  %747 = vperm.xlu1 %1866, %v701_v38   ;;  %v1160_v37 = vld [vmem:[%s2632_s5 + $0x68] sm:$0xff]  ;;  %v1161_v38 = vld [vmem:[%s2632_s5 + $0x70] sm:$0xff] }
  0x38   : > { %1768 = vmatpush3.bf16.xpose.msk.msra.mxu0 %vm2047_vm1, %v1763_v29  ;;  %v311_v29 = vld [vmem:[%s2628_s1 + $0x78] sm:$0xff] }
  0x39   : > { %1771 = vmatprep.subr.msk.bf16.mxu0 %vm2047_vm1, %v1769_v36 }
  0x3a   : > { %752 = vperm.xlu0 %1865, %v702_v41   ;;  %757 = vperm.xlu1 %1866, %v703_v42   ;;  %v1164_v41 = vld [vmem:[%s2632_s5 + $0x88] sm:$0xff]  ;;  %v1165_v42 = vld [vmem:[%s2632_s5 + $0x90] sm:$0xff] }
  0x3e   : > { %762 = vperm.xlu0 %1865, %v704_v44   ;;  %767 = vperm.xlu1 %1866, %v705_v45   ;;  %v1167_v44 = vld [vmem:[%s2632_s5 + $0xa0] sm:$0xff]  ;;  %v1168_v45 = vld [vmem:[%s2632_s5 + $0xa8] sm:$0xff] }
  0x40   : > { %1774 = vmatpush3.bf16.xpose.msk.msra.mxu0 %vm2047_vm1, %v1769_v36  ;;  %v1159_v36 = vld [vmem:[%s2632_s5 + $0x60] sm:$0xff] }
  0x41   : > { %1777 = vmatprep.subr.msk.bf16.mxu0 %vm2047_vm1, %v1775_v43 }
  0x42   : > { %772 = vperm.xlu0 %1865, %v706_v48   ;;  %777 = vperm.xlu1 %1866, %v707_v49   ;;  %v1171_v48 = vld [vmem:[%s2632_s5 + $0xc0] sm:$0xff]  ;;  %v1172_v49 = vld [vmem:[%s2632_s5 + $0xc8] sm:$0xff] }
  0x46   : > { %782 = vperm.xlu0 %1865, %v708_v51   ;;  %787 = vperm.xlu1 %1866, %v709_v52   ;;  %v727_v51 = vld [vmem:[%s2631_s4 + $0xe8] sm:$0xff]  ;;  %v1174_v52 = vld [vmem:[%s2632_s5 + $0xd8] sm:$0xff] }
  0x48   : > { %1780 = vmatpush3.bf16.xpose.msk.msra.mxu0 %vm2047_vm1, %v1775_v43  ;;  %v1166_v43 = vld [vmem:[%s2632_s5 + $0x98] sm:$0xff] }
  0x49   : > { %1783 = vmatprep.subr.msk.bf16.mxu0 %vm2047_vm1, %v1781_v50 }
  0x4a   : > { %792 = vperm.xlu0 %1865, %v710_v55   ;;  %797 = vperm.xlu1 %1866, %v711_v56   ;;  %v729_v55 = vld [vmem:[%s2631_s4 + $0xf8] sm:$0xff]  ;;  %v1176_v56 = vld [vmem:[%s2632_s5 + $0xe8] sm:$0xff] }
  0x4e   : > { %802 = vperm.xlu0 %1865, %v712_v58   ;;  %807 = vperm.xlu1 %1866, %v713_v59   ;;  %v1178_v58 = vld [vmem:[%s2632_s5 + $0xf8] sm:$0xff]  ;;  %v1408_v59 = vld [vmem:[#allocation2] sm:$0x1] }
  0x50   : > { %1786 = vmatpush3.bf16.xpose.msk.msra.mxu0 %vm2047_vm1, %v1781_v50  ;;  %v1173_v50 = vld [vmem:[%s2632_s5 + $0xd0] sm:$0xff] }
  0x51   : > { %1789 = vmatprep.subr.msk.bf16.mxu0 %vm2047_vm1, %v1787_v57 }
  0x52   : > { %812 = vperm.xlu0 %1865, %v714_v60   ;;  %817 = vperm.xlu1 %1866, %v715_v61   ;;  %v666_v60 = vld [vmem:[%s2630_s3] sm:$0xff] }
  0x53   : > { %1697 = vmatprep.mubr.f32.mxu1 %v666_v60 }
  0x56   : > { %822 = vperm.xlu0 %1865, %v716_v62   ;;  %827 = vperm.xlu1 %1866, %v717_v63  }
  0x58   : > { %1792 = vmatpush3.bf16.xpose.msk.msra.mxu0 %vm2047_vm1, %v1787_v57  ;;  %v1177_v57 = vld [vmem:[%s2632_s5 + $0xf0] sm:$0xff] }
  0x5a   : > { %832 = vperm.xlu0 %1865, %v718_v0   ;;  %837 = vperm.xlu1 %1866, %v719_v2  }
  0x5e   : > { %842 = vperm.xlu0 %1865, %v720_v4   ;;  %847 = vperm.xlu1 %1866, %v721_v6  }
  0x5f   : > { %1642 = vmatmul.mubr.msk.f32.vlgmr.msra.gmra.mrb[0].mxu0 %vm408_vm0, %v297_v1 }
  0x60   : > { %1644 = vmatprep.mubr.msk.f32.mxu0 %vm408_vm0, %v298_v3 }
  0x62   : > { %852 = vperm.xlu0 %1865, %v722_v8   ;;  %857 = vperm.xlu1 %1866, %v723_v10  }
  0x63   : > { %1645 = vmatmul.mubr.msk.f32.gmra.mrb[2].mxu0 %vm408_vm0, %v299_v5 }
  0x64   : > { %1647 = vmatprep.mubr.msk.f32.mxu0 %vm408_vm0, %v300_v7 }
  0x66   : > { %862 = vperm.xlu0 %1865, %v724_v12   ;;  %867 = vperm.xlu1 %1866, %v725_v14  }
  0x67   : > { %1648 = vmatmul.mubr.msk.f32.gmra.mrb[4].mxu0 %vm408_vm0, %v301_v9 }
  0x68   : > { %1650 = vmatprep.mubr.msk.f32.mxu0 %vm408_vm0, %v302_v11 }
  0x6a   : > { %872 = vperm.xlu0 %1865, %v726_v16   ;;  %1181 = vperm.xlu1 %1866, %v1147_v18  }
  0x6b   : > { %1651 = vmatmul.mubr.msk.f32.gmra.mrb[6].mxu0 %vm408_vm0, %v303_v13 }
  0x6c   : > { %1653 = vmatprep.mubr.msk.f32.mxu0 %vm408_vm0, %v304_v15 }
  0x6e   : > { %1186 = vperm.xlu0 %1865, %v1148_v20   ;;  %1191 = vperm.xlu1 %1866, %v1149_v22  }
  0x6f   : > { %1654 = vmatmul.mubr.msk.f32.gmra.mrb[8].mxu0 %vm408_vm0, %v305_v17 }
  0x70   : > { %1656 = vmatprep.mubr.msk.f32.mxu0 %vm408_vm0, %v306_v19 }
  0x72   : > { %1196 = vperm.xlu0 %1865, %v1150_v24   ;;  %1201 = vperm.xlu1 %1866, %v1151_v26  }
  0x73   : > { %1657 = vmatmul.mubr.msk.f32.gmra.mrb[10].mxu0 %vm408_vm0, %v307_v21 }
  0x74   : > { %1659 = vmatprep.mubr.msk.f32.mxu0 %vm408_vm0, %v308_v23 }
  0x76   : > { %1206 = vperm.xlu0 %1865, %v1152_v28   ;;  %1211 = vperm.xlu1 %1866, %v1153_v30  }
  0x77   : > { %1660 = vmatmul.mubr.msk.f32.gmra.mrb[12].mxu0 %vm408_vm0, %v309_v25 }
  0x78   : > { %1662 = vmatprep.mubr.msk.f32.mxu0 %vm408_vm0, %v310_v27 }
  0x7a   : > { %1216 = vperm.xlu0 %1865, %v1154_v31   ;;  %1221 = vperm.xlu1 %1866, %v1155_v32  }
  0x7b   : > { %1663 = vmatmul.mubr.msk.f32.gmra.mrb[14].mxu0 %vm408_vm0, %v311_v29 }
  0x7e   : > { %1226 = vperm.xlu0 %1865, %v1156_v33   ;;  %1231 = vperm.xlu1 %1866, %v1157_v34  }
  0x82   : > { %1236 = vperm.xlu0 %1865, %v1158_v35   ;;  %1241 = vperm.xlu1 %1866, %v1159_v36  }
  0x86   : > { %1246 = vperm.xlu0 %1865, %v1160_v37   ;;  %1251 = vperm.xlu1 %1866, %v1161_v38  }
  0x8a   : > { %1256 = vperm.xlu0 %1865, %v1162_v39   ;;  %1261 = vperm.xlu1 %1866, %v1163_v40  }
  0x8e   : > { %1266 = vperm.xlu0 %1865, %v1164_v41   ;;  %1271 = vperm.xlu1 %1866, %v1165_v42  }
  0x91   : > { %v341_v61 = vpop.permute.xlu1 %340  ;;  %v331_v62 = vpop.permute.xlu0 %330 }
  0x92   : > { %1276 = vperm.xlu0 %1865, %v1166_v43   ;;  %1281 = vperm.xlu1 %1866, %v1167_v44  }
  0x95   : > { %v346_v63 = vpop.permute.xlu1 %345  ;;  %v336_v0 = vpop.permute.xlu0 %335 }
  0x96   : > { %1286 = vperm.xlu0 %1865, %v1168_v45   ;;  %1291 = vperm.xlu1 %1866, %v1169_v46  }
  0x99   : > { %v356_v1 = vpop.permute.xlu1 %355  ;;  %v351_v2 = vpop.permute.xlu0 %350 }
  0x9a   : > { %1296 = vperm.xlu0 %1865, %v1170_v47   ;;  %1301 = vperm.xlu1 %1866, %v1171_v48  }
  0x9d   : > { %v366_v8 = vpop.permute.xlu1 %365  ;;  %v361_v11 = vpop.permute.xlu0 %360 }
  0x9e   : > { %1306 = vperm.xlu0 %1865, %v1172_v49   ;;  %1311 = vperm.xlu1 %1866, %v1173_v50  }
  0xa1   : > { %v376_v21 = vpop.permute.xlu1 %375  ;;  %v371_v24 = vpop.permute.xlu0 %370 }
  0xa2   : > { %877 = vperm.xlu0 %1865, %v727_v51   ;;  %1316 = vperm.xlu1 %1866, %v1174_v52  }
  0xa5   : > { %v386_v33 = vpop.permute.xlu1 %385  ;;  %v381_v36 = vpop.permute.xlu0 %380 }
  0xa6   : > { %882 = vperm.xlu0 %1865, %v728_v53   ;;  %1321 = vperm.xlu1 %1866, %v1175_v54  }
  0xa9   : > { %v396_v46 = vpop.permute.xlu1 %395  ;;  %v391_v49 = vpop.permute.xlu0 %390 }
  0xaa   : > { %887 = vperm.xlu0 %1865, %v729_v55   ;;  %1326 = vperm.xlu1 %1866, %v1176_v56  }
  0xae   : > { %1331 = vperm.xlu0 %1865, %v1177_v57   ;;  %1336 = vperm.xlu1 %1866, %v1178_v58   ;;  %v406_v58 = vpop.permute.xlu1 %405 }
  0xb2   : > { %1411 = vperm.xlu0 %1865, %v1408_v59  }
 0x132   : > { %v1643_v3 = vpop.f32.mrb[0].mxu0 }
 0x133   : > { %v577_v4 = vadd.f32 %v1643_v3, %v336_v0  ;;  %v571_v5 = vpop.f32.mrb[1].mxu0 }
 0x134   : > { %v572_v6 = vadd.f32 %v571_v5, %v331_v62  ;;  %v667_v5 = vld [vmem:[%s2630_s3 + $0x8] sm:$0xff] }
 0x135   : > { %v651_v7 = vmax.f32 %v577_v4, 0.0 }
 0x136   : > { %v650_v9 = vmax.f32 %v572_v6, 0.0  ;;  %v1646_v10 = vpop.f32.mrb[2].mxu0  ;;  %v668_v6 = vld [vmem:[%s2630_s3 + $0x10] sm:$0xff] }
 0x137   : > { %v587_v12 = vadd.f32 %v1646_v10, %v346_v63  ;;  %v581_v13 = vpop.f32.mrb[3].mxu0  ;;  %v672_v10 = vld [vmem:[%s2630_s3 + $0x30] sm:$0xff] }
 0x138   : > { %v582_v14 = vadd.f32 %v581_v13, %v341_v61  ;;  %v1793_v15 = vpack.c.bf16 %v651_v7, %v650_v9  ;;  %v401_v61 = vpop.permute.xlu0 %400  ;;  %v669_v7 = vld [vmem:[%s2630_s3 + $0x18] sm:$0xff]  ;;  %v671_v9 = vld [vmem:[%s2630_s3 + $0x28] sm:$0xff] }
 0x139   : > { %v653_v16 = vmax.f32 %v587_v12, 0.0  ;;  %v674_v12 = vld [vmem:[%s2630_s3 + $0x40] sm:$0xff]  ;;  %v675_v13 = vld [vmem:[%s2630_s3 + $0x48] sm:$0xff] }
 0x13a   : > { %v652_v17 = vmax.f32 %v582_v14, 0.0  ;;  %v1649_v18 = vpop.f32.mrb[4].mxu0  ;;  %1794 = vmatprep.subr.bf16.mxu1 %v1793_v15  ;;  %v676_v14 = vld [vmem:[%s2630_s3 + $0x50] sm:$0xff] }
 0x13b   : > { %v597_v19 = vadd.f32 %v1649_v18, %v356_v1  ;;  %v591_v20 = vpop.f32.mrb[5].mxu0  ;;  %1796 = vmatpush3.bf16.msra.mxu1 %v1793_v15  ;;  %v677_v15 = vld [vmem:[%s2630_s3 + $0x58] sm:$0xff]  ;;  %v680_v18 = vld [vmem:[%s2630_s3 + $0x70] sm:$0xff] }
 0x13c   : > { %v1797_v22 = vpack.c.bf16 %v653_v16, %v652_v17  ;;  %v592_v23 = vadd.f32 %v591_v20, %v351_v2  ;;  %v678_v16 = vld [vmem:[%s2630_s3 + $0x60] sm:$0xff]  ;;  %v679_v17 = vld [vmem:[%s2630_s3 + $0x68] sm:$0xff] }
 0x13d   : > { %v655_v25 = vmax.f32 %v597_v19, 0.0  ;;  %v681_v19 = vld [vmem:[%s2630_s3 + $0x78] sm:$0xff]  ;;  %v682_v20 = vld [vmem:[%s2630_s3 + $0x80] sm:$0xff] }
 0x13e   : > { %v654_v26 = vmax.f32 %v592_v23, 0.0  ;;  %v1652_v27 = vpop.f32.mrb[6].mxu0  ;;  %1798 = vmatprep.subr.bf16.mxu1 %v1797_v22  ;;  %v685_v23 = vld [vmem:[%s2630_s3 + $0x98] sm:$0xff] }
 0x13f   : > { %v607_v28 = vadd.f32 %v1652_v27, %v366_v8  ;;  %v601_v29 = vpop.f32.mrb[7].mxu0  ;;  %1800 = vmatpush3.bf16.msra.mxu1 %v1797_v22  ;;  %v670_v8 = vld [vmem:[%s2630_s3 + $0x20] sm:$0xff]  ;;  %v684_v22 = vld [vmem:[%s2630_s3 + $0x90] sm:$0xff]  ;;  %v689_v27 = vld [vmem:[%s2630_s3 + $0xb8] sm:$0xff] }
 0x140   : > { %v1801_v30 = vpack.c.bf16 %v655_v25, %v654_v26  ;;  %v602_v31 = vadd.f32 %v601_v29, %v361_v11  ;;  %v673_v11 = vld [vmem:[%s2630_s3 + $0x38] sm:$0xff]  ;;  %v687_v25 = vld [vmem:[%s2630_s3 + $0xa8] sm:$0xff]  ;;  %v688_v26 = vld [vmem:[%s2630_s3 + $0xb0] sm:$0xff] }
 0x141   : > { %v657_v32 = vmax.f32 %v607_v28, 0.0  ;;  %v690_v28 = vld [vmem:[%s2630_s3 + $0xc0] sm:$0xff]  ;;  %v691_v29 = vld [vmem:[%s2630_s3 + $0xc8] sm:$0xff] }
 0x142   : > { %v656_v34 = vmax.f32 %v602_v31, 0.0  ;;  %v1655_v35 = vpop.f32.mrb[8].mxu0  ;;  %1802 = vmatprep.subr.bf16.mxu1 %v1801_v30  ;;  %v693_v31 = vld [vmem:[%s2630_s3 + $0xd8] sm:$0xff] }
 0x143   : > { %v617_v37 = vadd.f32 %v1655_v35, %v376_v21  ;;  %v611_v38 = vpop.f32.mrb[9].mxu0  ;;  %1804 = vmatpush3.bf16.msra.mxu1 %v1801_v30  ;;  %v683_v21 = vld [vmem:[%s2630_s3 + $0x88] sm:$0xff]  ;;  %v692_v30 = vld [vmem:[%s2630_s3 + $0xd0] sm:$0xff]  ;;  %v697_v35 = vld [vmem:[%s2630_s3 + $0xf8] sm:$0xff] }
 0x144   : > { %v1805_v39 = vpack.c.bf16 %v657_v32, %v656_v34  ;;  %v612_v40 = vadd.f32 %v611_v38, %v371_v24  ;;  %v686_v24 = vld [vmem:[%s2630_s3 + $0xa0] sm:$0xff]  ;;  %v696_v34 = vld [vmem:[%s2630_s3 + $0xf0] sm:$0xff] }
 0x145   : > { %v659_v41 = vmax.f32 %v617_v37, 0.0  ;;  %v694_v32 = vld [vmem:[%s2630_s3 + $0xe0] sm:$0xff]  ;;  %v738_v37 = vpop.permute.xlu1 %737 }
 0x146   : > { %v658_v42 = vmax.f32 %v612_v40, 0.0  ;;  %v1658_v43 = vpop.f32.mrb[10].mxu0  ;;  %1806 = vmatprep.subr.bf16.mxu1 %v1805_v39 }
 0x147   : > { %v627_v44 = vadd.f32 %v1658_v43, %v386_v33  ;;  %v621_v45 = vpop.f32.mrb[11].mxu0  ;;  %1808 = vmatpush3.bf16.msra.mxu1 %v1805_v39  ;;  %v695_v33 = vld [vmem:[%s2630_s3 + $0xe8] sm:$0xff] }
 0x148   : > { %v1809_v47 = vpack.c.bf16 %v659_v41, %v658_v42  ;;  %v622_v48 = vadd.f32 %v621_v45, %v381_v36  ;;  %v733_v36 = vpop.permute.xlu0 %732 }
 0x149   : > { %v661_v50 = vmax.f32 %v627_v44, 0.0  ;;  %v748_v39 = vpop.permute.xlu1 %747 }
 0x14a   : > { %v660_v51 = vmax.f32 %v622_v48, 0.0  ;;  %v1661_v52 = vpop.f32.mrb[12].mxu0  ;;  %1810 = vmatprep.subr.bf16.mxu1 %v1809_v47 }
 0x14b   : > { %v637_v53 = vadd.f32 %v1661_v52, %v396_v46  ;;  %v631_v54 = vpop.f32.mrb[13].mxu0  ;;  %1812 = vmatpush3.bf16.msra.mxu1 %v1809_v47 }
 0x14c   : > { %v1813_v55 = vpack.c.bf16 %v661_v50, %v660_v51  ;;  %v632_v56 = vadd.f32 %v631_v54, %v391_v49  ;;  %v743_v38 = vpop.permute.xlu0 %742 }
 0x14d   : > { %v663_v57 = vmax.f32 %v637_v53, 0.0  ;;  %v758_v41 = vpop.permute.xlu1 %757 }
 0x14e   : > { %v662_v59 = vmax.f32 %v632_v56, 0.0  ;;  %v1664_v60 = vpop.f32.mrb[14].mxu0  ;;  %1814 = vmatprep.subr.bf16.mxu1 %v1813_v55 }
 0x14f   : > { %v647_v62 = vadd.f32 %v1664_v60, %v406_v58  ;;  %v641_v63 = vpop.f32.mrb[15].mxu0  ;;  %1816 = vmatpush3.bf16.msra.mxu1 %v1813_v55 }
 0x150   : > { %v1817_v0 = vpack.c.bf16 %v663_v57, %v662_v59  ;;  %v642_v1 = vadd.f32 %v641_v63, %v401_v61  ;;  %v753_v40 = vpop.permute.xlu0 %752 }
 0x151   : > { %v665_v2 = vmax.f32 %v647_v62, 0.0  ;;  %v2486_v43 = vpop.permute.xlu1 %767 }
 0x152   : > { %v664_v3 = vmax.f32 %v642_v1, 0.0  ;;  %1818 = vmatprep.subr.bf16.mxu1 %v1817_v0 }
 0x153   : > { %1820 = vmatpush3.bf16.msra.mxu1 %v1817_v0 }
 0x154   : > { %v1821_v4 = vpack.c.bf16 %v665_v2, %v664_v3  ;;  %v2484_v42 = vpop.permute.xlu0 %762 }
 0x155   : > { %v2490_v45 = vpop.permute.xlu1 %777 }
 0x156   : > { %1822 = vmatprep.subr.bf16.mxu1 %v1821_v4 }
 0x157   : > { %1824 = vmatpush3.bf16.msra.mxu1 %v1821_v4 }
 0x158   : > { %v2488_v44 = vpop.permute.xlu0 %772 }
 0x159   : > { %v2494_v47 = vpop.permute.xlu1 %787 }
 0x15a   : > { %1698 = vmatmul.mubr.f32.vlgmr.msra.gmra.mrb[0].mxu1 %v667_v5 }
 0x15b   : > { %1700 = vmatprep.mubr.f32.mxu1 %v668_v6 }
 0x15c   : > { %v2492_v46 = vpop.permute.xlu0 %782 }
 0x15d   : > { %v2498_v49 = vpop.permute.xlu1 %797 }
 0x15e   : > { %1701 = vmatmul.mubr.f32.gmra.mrb[2].mxu1 %v669_v7 }
 0x15f   : > { %1703 = vmatprep.mubr.f32.mxu1 %v670_v8 }
 0x160   : > { %v2496_v48 = vpop.permute.xlu0 %792 }
 0x161   : > { %v2502_v51 = vpop.permute.xlu1 %807 }
 0x162   : > { %1704 = vmatmul.mubr.f32.gmra.mrb[4].mxu1 %v671_v9 }
 0x163   : > { %1706 = vmatprep.mubr.f32.mxu1 %v672_v10 }
 0x164   : > { %v2500_v50 = vpop.permute.xlu0 %802 }
 0x165   : > { %v2506_v53 = vpop.permute.xlu1 %817 }
 0x166   : > { %1707 = vmatmul.mubr.f32.gmra.mrb[6].mxu1 %v673_v11 }
 0x167   : > { %1709 = vmatprep.mubr.f32.mxu1 %v674_v12 }
 0x168   : > { %v2504_v52 = vpop.permute.xlu0 %812 }
 0x169   : > { %v2510_v55 = vpop.permute.xlu1 %827 }
 0x16a   : > { %1710 = vmatmul.mubr.f32.gmra.mrb[8].mxu1 %v675_v13 }
 0x16b   : > { %1712 = vmatprep.mubr.f32.mxu1 %v676_v14 }
 0x16c   : > { %v2508_v54 = vpop.permute.xlu0 %822 }
 0x16d   : > { %v2514_v57 = vpop.permute.xlu1 %837 }
 0x16e   : > { %1713 = vmatmul.mubr.f32.gmra.mrb[10].mxu1 %v677_v15 }
 0x16f   : > { %1715 = vmatprep.mubr.f32.mxu1 %v678_v16 }
 0x170   : > { %v2512_v56 = vpop.permute.xlu0 %832 }
 0x171   : > { %v2518_v59 = vpop.permute.xlu1 %847 }
 0x172   : > { %1716 = vmatmul.mubr.f32.gmra.mrb[12].mxu1 %v679_v17 }
 0x173   : > { %1718 = vmatprep.mubr.f32.mxu1 %v680_v18 }
 0x174   : > { %v2516_v58 = vpop.permute.xlu0 %842 }
 0x175   : > { %v2522_v61 = vpop.permute.xlu1 %857 }
 0x176   : > { %1719 = vmatmul.mubr.f32.gmra.mrb[14].mxu1 %v681_v19 }
 0x177   : > { %1721 = vmatprep.mubr.f32.mxu1 %v682_v20 }
 0x178   : > { %v2520_v60 = vpop.permute.xlu0 %852 }
 0x179   : > { %v2526_v63 = vpop.permute.xlu1 %867 }
 0x17a   : > { %1722 = vmatmul.mubr.f32.gmra.mrb[16].mxu1 %v683_v21 }
 0x17b   : > { %1724 = vmatprep.mubr.f32.mxu1 %v684_v22 }
 0x17c   : > { %v2524_v62 = vpop.permute.xlu0 %862 }
 0x17d   : > { %v1182_v1 = vpop.permute.xlu1 %1181 }
 0x17e   : > { %1725 = vmatmul.mubr.f32.gmra.mrb[18].mxu1 %v685_v23 }
 0x17f   : > { %1727 = vmatprep.mubr.f32.mxu1 %v686_v24 }
 0x180   : > { %v2528_v0 = vpop.permute.xlu0 %872 }
 0x181   : > { %v1192_v3 = vpop.permute.xlu1 %1191 }
 0x182   : > { %1728 = vmatmul.mubr.f32.gmra.mrb[20].mxu1 %v687_v25 }
 0x183   : > { %1730 = vmatprep.mubr.f32.mxu1 %v688_v26 }
 0x184   : > { %v1187_v2 = vpop.permute.xlu0 %1186 }
 0x185   : > { %v1202_v5 = vpop.permute.xlu1 %1201 }
 0x186   : > { %1731 = vmatmul.mubr.f32.gmra.mrb[22].mxu1 %v689_v27 }
 0x187   : > { %1733 = vmatprep.mubr.f32.mxu1 %v690_v28 }
 0x188   : > { %v1197_v4 = vpop.permute.xlu0 %1196 }
 0x189   : > { %v1212_v7 = vpop.permute.xlu1 %1211 }
 0x18a   : > { %1734 = vmatmul.mubr.f32.gmra.mrb[24].mxu1 %v691_v29 }
 0x18b   : > { %1736 = vmatprep.mubr.f32.mxu1 %v692_v30 }
 0x18c   : > { %v1207_v6 = vpop.permute.xlu0 %1206 }
 0x18d   : > { %v1222_v9 = vpop.permute.xlu1 %1221 }
 0x18e   : > { %1737 = vmatmul.mubr.f32.gmra.mrb[26].mxu1 %v693_v31 }
 0x18f   : > { %1739 = vmatprep.mubr.f32.mxu1 %v694_v32 }
 0x190   : > { %v1217_v8 = vpop.permute.xlu0 %1216 }
 0x191   : > { %v2530_v11 = vpop.permute.xlu1 %1231 }
 0x192   : > { %1740 = vmatmul.mubr.f32.gmra.mrb[28].mxu1 %v695_v33 }
 0x193   : > { %1742 = vmatprep.mubr.f32.mxu1 %v696_v34 }
 0x194   : > { %v1227_v10 = vpop.permute.xlu0 %1226 }
 0x195   : > { %v2534_v14 = vpop.permute.xlu1 %1241 }
 0x196   : > { %1743 = vmatmul.mubr.f32.gmra.mrb[30].mxu1 %v697_v35 }
 0x198   : > { %v2532_v12 = vpop.permute.xlu0 %1236 }
 0x199   : > { %v2538_v27 = vpop.permute.xlu1 %1251 }
 0x19c   : > { %v2536_v21 = vpop.permute.xlu0 %1246 }
 0x22d   : > { %v1699_v13 = vpop.f32.mrb[0].mxu1 }
 0x22e   : > { %v962_v15 = vadd.f32 %v1699_v13, %v738_v37  ;;  %v956_v16 = vpop.f32.mrb[1].mxu1 }
 0x22f   : > { %v957_v17 = vadd.f32 %v956_v16, %v733_v36  ;;  %v2540_v36 = vpop.permute.xlu0 %1256  ;;  %v2542_v16 = vpop.permute.xlu1 %1261 }
 0x230   : > { %v1116_v18 = vmax.f32 %v962_v15, 0.0 }
 0x231   : > { %v1115_v19 = vmax.f32 %v957_v17, 0.0  ;;  %v1702_v20 = vpop.f32.mrb[2].mxu1 }
 0x232   : > { %v1340_v22 = vmul.f32 %v1187_v2, %v1116_v18  ;;  %v972_v23 = vadd.f32 %v1702_v20, %v748_v39  ;;  %v966_v24 = vpop.f32.mrb[3].mxu1 }
 0x233   : > { %v1339_v25 = vmul.f32 %v1182_v1, %v1115_v19  ;;  %v967_v26 = vadd.f32 %v966_v24, %v743_v38 }
 0x234   : > { %v1118_v29 = vmax.f32 %v972_v23, 0.0  ;;  %v2546_v23 = vpop.permute.xlu0 %1266 }
 0x235   : > { %v1371_v28 = vadd.f32 %v1340_v22, %v1339_v25  ;;  %v1117_v30 = vmax.f32 %v967_v26, 0.0  ;;  %v1705_v31 = vpop.f32.mrb[4].mxu1 }
 0x236   : > { %v982_v32 = vadd.f32 %v1705_v31, %v758_v41  ;;  %v976_v33 = vpop.f32.mrb[5].mxu1  ;;  %v1342_v37 = vmul.f32 %v1197_v4, %v1118_v29 }
 0x237   : > { %v1341_v34 = vmul.f32 %v1192_v3, %v1117_v30  ;;  %v977_v35 = vadd.f32 %v976_v33, %v753_v40 }
 0x238   : > { %v1120_v15 = vmax.f32 %v982_v32, 0.0 }
 0x239   : > { %v1372_v13 = vadd.f32 %v1371_v28, %v1341_v34  ;;  %v1119_v2 = vmax.f32 %v977_v35, 0.0  ;;  %v1708_v39 = vpop.f32.mrb[6].mxu1 }
 0x23a   : > { %v992_v38 = vadd.f32 %v1708_v39, %v2486_v43  ;;  %v986_v1 = vpop.f32.mrb[7].mxu1  ;;  %v1344_v41 = vmul.f32 %v1207_v6, %v1120_v15  ;;  %v2550_v43 = vpop.permute.xlu1 %1271 }
 0x23b   : > { %v1343_v17 = vmul.f32 %v1202_v5, %v1119_v2  ;;  %v1373_v18 = vadd.f32 %v1372_v13, %v1342_v37  ;;  %v987_v19 = vadd.f32 %v986_v1, %v2484_v42 }
 0x23c   : > { %v1122_v3 = vmax.f32 %v992_v38, 0.0 }
 0x23d   : > { %v1374_v20 = vadd.f32 %v1373_v18, %v1343_v17  ;;  %v1121_v40 = vmax.f32 %v987_v19, 0.0  ;;  %v1711_v22 = vpop.f32.mrb[8].mxu1 }
 0x23e   : > { %v1002_v4 = vadd.f32 %v1711_v22, %v2490_v45  ;;  %v996_v24 = vpop.f32.mrb[9].mxu1  ;;  %v1346_v5 = vmul.f32 %v1217_v8, %v1122_v3  ;;  %v1277_v45 = vpop.permute.xlu0 %1276 }
 0x23f   : > { %v1345_v25 = vmul.f32 %v1212_v7, %v1121_v40  ;;  %v1375_v26 = vadd.f32 %v1374_v20, %v1344_v41  ;;  %v997_v28 = vadd.f32 %v996_v24, %v2488_v44  ;;  %v1282_v2 = vpop.permute.xlu1 %1281 }
 0x240   : > { %v1124_v30 = vmax.f32 %v1002_v4, 0.0 }
 0x241   : > { %v1376_v29 = vadd.f32 %v1375_v26, %v1345_v25  ;;  %v1123_v42 = vmax.f32 %v997_v28, 0.0  ;;  %v1714_v6 = vpop.f32.mrb[10].mxu1 }
 0x242   : > { %v1012_v31 = vadd.f32 %v1714_v6, %v2494_v47  ;;  %v1006_v32 = vpop.f32.mrb[11].mxu1  ;;  %v1348_v37 = vmul.f32 %v1227_v10, %v1124_v30  ;;  %v1287_v10 = vpop.permute.xlu0 %1286 }
 0x243   : > { %v1347_v33 = vmul.f32 %v1222_v9, %v1123_v42  ;;  %v1377_v34 = vadd.f32 %v1376_v29, %v1346_v5  ;;  %v1007_v35 = vadd.f32 %v1006_v32, %v2492_v46  ;;  %v1292_v22 = vpop.permute.xlu1 %1291 }
 0x244   : > { %v1126_v13 = vmax.f32 %v1012_v31, 0.0 }
 0x245   : > { %v1378_v7 = vadd.f32 %v1377_v34, %v1347_v33  ;;  %v1125_v15 = vmax.f32 %v1007_v35, 0.0  ;;  %v1717_v44 = vpop.f32.mrb[12].mxu1 }
 0x246   : > { %v1022_v8 = vadd.f32 %v1717_v44, %v2498_v49  ;;  %v1016_v39 = vpop.f32.mrb[13].mxu1  ;;  %v1350_v9 = vmul.f32 %v2532_v12, %v1126_v13  ;;  %v1297_v29 = vpop.permute.xlu0 %1296 }
 0x247   : > { %v1349_v38 = vmul.f32 %v2530_v11, %v1125_v15  ;;  %v1379_v1 = vadd.f32 %v1378_v7, %v1348_v37  ;;  %v1017_v47 = vadd.f32 %v1016_v39, %v2496_v48 }
 0x248   : > { %v1128_v18 = vmax.f32 %v1022_v8, 0.0 }
 0x249   : > { %v1380_v17 = vadd.f32 %v1379_v1, %v1349_v38  ;;  %v1127_v46 = vmax.f32 %v1017_v47, 0.0  ;;  %v1720_v19 = vpop.f32.mrb[14].mxu1 }
 0x24a   : > { %v1032_v41 = vadd.f32 %v1720_v19, %v2502_v51  ;;  %v1026_v20 = vpop.f32.mrb[15].mxu1  ;;  %v1352_v11 = vmul.f32 %v2536_v21, %v1128_v18  ;;  %v1302_v21 = vpop.permute.xlu1 %1301 }
 0x24b   : > { %v1351_v3 = vmul.f32 %v2534_v14, %v1127_v46  ;;  %v1381_v40 = vadd.f32 %v1380_v17, %v1350_v9  ;;  %v1027_v49 = vadd.f32 %v1026_v20, %v2500_v50 }
 0x24c   : > { %v1130_v48 = vmax.f32 %v1032_v41, 0.0 }
 0x24d   : > { %v1382_v4 = vadd.f32 %v1381_v40, %v1351_v3  ;;  %v1129_v24 = vmax.f32 %v1027_v49, 0.0  ;;  %v1723_v12 = vpop.f32.mrb[16].mxu1 }
 0x24e   : > { %v1042_v25 = vadd.f32 %v1723_v12, %v2506_v53  ;;  %v1036_v26 = vpop.f32.mrb[17].mxu1  ;;  %v1354_v14 = vmul.f32 %v2540_v36, %v1130_v48  ;;  %v1307_v36 = vpop.permute.xlu0 %1306 }
 0x24f   : > { %v1353_v28 = vmul.f32 %v2538_v27, %v1129_v24  ;;  %v1383_v5 = vadd.f32 %v1382_v4, %v1352_v11  ;;  %v1037_v51 = vadd.f32 %v1036_v26, %v2504_v52  ;;  %v1312_v39 = vpop.permute.xlu1 %1311 }
 0x250   : > { %v1132_v50 = vmax.f32 %v1042_v25, 0.0 }
 0x251   : > { %v1384_v30 = vadd.f32 %v1383_v5, %v1353_v28  ;;  %v1131_v42 = vmax.f32 %v1037_v51, 0.0  ;;  %v1726_v6 = vpop.f32.mrb[18].mxu1 }
 0x252   : > { %v1052_v31 = vadd.f32 %v1726_v6, %v2510_v55  ;;  %v1046_v32 = vpop.f32.mrb[19].mxu1  ;;  %v1356_v27 = vmul.f32 %v2546_v23, %v1132_v50 }
 0x253   : > { %v1355_v33 = vmul.f32 %v2542_v16, %v1131_v42  ;;  %v1385_v53 = vadd.f32 %v1384_v30, %v1354_v14  ;;  %v1047_v34 = vadd.f32 %v1046_v32, %v2508_v54 }
 0x254   : > { %v1134_v52 = vmax.f32 %v1052_v31, 0.0 }
 0x255   : > { %v1386_v35 = vadd.f32 %v1385_v53, %v1355_v33  ;;  %v1133_v37 = vmax.f32 %v1047_v34, 0.0  ;;  %v1729_v7 = vpop.f32.mrb[20].mxu1 }
 0x256   : > { %v1062_v13 = vadd.f32 %v1729_v7, %v2514_v57  ;;  %v1056_v15 = vpop.f32.mrb[21].mxu1  ;;  %v1358_v16 = vmul.f32 %v1277_v45, %v1134_v52  ;;  %v878_v57 = vpop.permute.xlu0 %877 }
 0x257   : > { %v1357_v44 = vmul.f32 %v2550_v43, %v1133_v37  ;;  %v1387_v8 = vadd.f32 %v1386_v35, %v1356_v27  ;;  %v1057_v55 = vadd.f32 %v1056_v15, %v2512_v56  ;;  %v1317_v56 = vpop.permute.xlu1 %1316 }
 0x258   : > { %v1136_v1 = vmax.f32 %v1062_v13, 0.0 }
 0x259   : > { %v1388_v38 = vadd.f32 %v1387_v8, %v1357_v44  ;;  %v1135_v54 = vmax.f32 %v1057_v55, 0.0  ;;  %v1732_v47 = vpop.f32.mrb[22].mxu1 }
 0x25a   : > { %v1072_v23 = vadd.f32 %v1732_v47, %v2518_v59  ;;  %v1066_v9 = vpop.f32.mrb[23].mxu1  ;;  %v1360_v19 = vmul.f32 %v1287_v10, %v1136_v1  ;;  %v1414_v1 = vlaneseq }
 0x25b   : > { %v1359_v17 = vmul.f32 %v1282_v2, %v1135_v54  ;;  %v1389_v18 = vadd.f32 %v1388_v38, %v1358_v16  ;;  %v1067_v46 = vadd.f32 %v1066_v9, %v2516_v58  ;;  %v883_v58 = vpop.permute.xlu0 %882  ;;  %v1322_v51 = vpop.permute.xlu1 %1321 }
 0x25c   : > { %v1138_v43 = vmax.f32 %v1072_v23, 0.0  ;;  %v1415_v23 = vshrl.u32 %v1414_v1, 7 }
 0x25d   : > { %v1390_v41 = vadd.f32 %v1389_v18, %v1359_v17  ;;  %v1137_v20 = vmax.f32 %v1067_v46, 0.0  ;;  %v1735_v3 = vpop.f32.mrb[24].mxu1 }
 0x25e   : > { %v1082_v45 = vadd.f32 %v1735_v3, %v2522_v61  ;;  %v1076_v40 = vpop.f32.mrb[25].mxu1  ;;  %v1362_v59 = vmul.f32 %v1297_v29, %v1138_v43  ;;  %v1416_v18 = vsub.s32 0, %v1415_v23 }
 0x25f   : > { %v1361_v49 = vmul.f32 %v1292_v22, %v1137_v20  ;;  %v1391_v11 = vadd.f32 %v1390_v41, %v1360_v19  ;;  %v1077_v4 = vadd.f32 %v1076_v40, %v2520_v60  ;;  %v888_v32 = vpop.permute.xlu0 %887  ;;  %v1327_v27 = vpop.permute.xlu1 %1326 }
 0x260   : > { %v1140_v2 = vmax.f32 %v1082_v45, 0.0 }
 0x261   : > { %v1392_v48 = vadd.f32 %v1391_v11, %v1361_v49  ;;  %v1139_v24 = vmax.f32 %v1077_v4, 0.0  ;;  %v1738_v12 = vpop.f32.mrb[26].mxu1 }
 0x262   : > { %v1092_v10 = vadd.f32 %v1738_v12, %v2526_v63  ;;  %v1086_v25 = vpop.f32.mrb[27].mxu1  ;;  %v1364_v61 = vmul.f32 %v1307_v36, %v1140_v2 }
 0x263   : > { %v1363_v26 = vmul.f32 %v1302_v21, %v1139_v24  ;;  %v1393_v28 = vadd.f32 %v1392_v48, %v1362_v59  ;;  %v1087_v5 = vadd.f32 %v1086_v25, %v2524_v62  ;;  %v1332_v8 = vpop.permute.xlu0 %1331 }
 0x264   : > { %v1142_v22 = vmax.f32 %v1092_v10, 0.0 }
 0x265   : > { %v1394_v14 = vadd.f32 %v1393_v28, %v1363_v26  ;;  %v1141_v30 = vmax.f32 %v1087_v5, 0.0  ;;  %v1741_v50 = vpop.f32.mrb[28].mxu1 }
 0x266   : > { %v1102_v60 = vadd.f32 %v1741_v50, %v878_v57  ;;  %v1096_v29 = vpop.f32.mrb[29].mxu1  ;;  %v1366_v33 = vmul.f32 %v1317_v56, %v1142_v22 }
 0x267   : > { %v1365_v42 = vmul.f32 %v1312_v39, %v1141_v30  ;;  %v1395_v6 = vadd.f32 %v1394_v14, %v1364_v61  ;;  %v1097_v31 = vadd.f32 %v1096_v29, %v2528_v0  ;;  %v1337_v39 = vpop.permute.xlu1 %1336  ;;  %v1412_v57 = vpop.permute.xlu0 %1411 }
 0x268   : > { %v1144_v53 = vmax.f32 %v1102_v60, 0.0  ;;  %v1417_v41 = vrot.slane %v1412_v57, %v1416_v18 }
 0x269   : > { %v1396_v63 = vadd.f32 %v1395_v6, %v1365_v42  ;;  %v1143_v21 = vmax.f32 %v1097_v31, 0.0  ;;  %v1744_v34 = vpop.f32.mrb[30].mxu1 }
 0x26a   : > { %v1112_v62 = vadd.f32 %v1744_v34, %v888_v32  ;;  %v1106_v35 = vpop.f32.mrb[31].mxu1  ;;  %v1368_v36 = vmul.f32 %v1327_v27, %v1144_v53 }
 0x26b   : > { %v1367_v52 = vmul.f32 %v1322_v51, %v1143_v21  ;;  %v1397_v37 = vadd.f32 %v1396_v63, %v1366_v33  ;;  %v1107_v7 = vadd.f32 %v1106_v35, %v883_v58 }
 0x26c   : > { %v1146_v15 = vmax.f32 %v1112_v62, 0.0 }
 0x26d   : > { %v1398_v13 = vadd.f32 %v1397_v37, %v1367_v52  ;;  %v1145_v44 = vmax.f32 %v1107_v7, 0.0 }
 0x26e   : > { %v1370_v16 = vmul.f32 %v1337_v39, %v1146_v15 }
 0x26f   : > { %v1369_v55 = vmul.f32 %v1332_v8, %v1145_v44  ;;  %v1399_v0 = vadd.f32 %v1398_v13, %v1368_v36 }
 0x271   : > { %v1400_v38 = vadd.f32 %v1399_v0, %v1369_v55 }
 0x273   : > { %v1401_v54 = vadd.f32 %v1400_v38, %v1370_v16 }
 0x275   : > { %v1402_v47 = vrot.slane %v1401_v54, 4 }
 0x277   : > { %v1403_v9 = vadd.f32 %v1402_v47, %v1401_v54 }
 0x279   : > { %v1404_v17 = vrot.slane %v1403_v9, 2 }
 0x27b   : > { %v1405_v46 = vadd.f32 %v1404_v17, %v1403_v9 }
 0x27d   : > { %v1406_v19 = vrot.slane %v1405_v46, 1 }
 0x27f   : > { %v1407_v43 = vadd.f32 %v1406_v19, %v1405_v46 }
 0x281   : > { %v1418_v20 = vadd.f32 %v1417_v41, %v1407_v43 }
 0x283   : > { %1419 = vst [vmem:[%s273_s25] sm:$0x1] %v1418_v20 }
 0x284   : > { %1880 = shalt.err (!%p1877_p3)
}
 0x285   : > { %s1881_s18 = scalar_lea.hbm %s2585_s9, 16  ;;  %s1885_s22 = scalar_lea.hbm %s2634_s7, 32 }
 0x286   : > { %p1882_p4 = scmp.ne.s32.totalorder %s2585_s9, %s1881_s18  ;;  %p1886_p9 = scmp.lt.u32.totalorder %s2585_s9, %s2634_s7 }
 0x287   : > { %p1887_p10 = scmp.lt.u32.totalorder %s1885_s22, %s1881_s18  ;;  %p1889_p12 = scmp.lt.u32.totalorder %s1881_s18, %s2585_s9 }
 0x288   : > { %p1883_p7 = pnand %p1882_p4, %p2011_p5 }
 0x289   : > { %p1888_p11 = por %p1887_p10, %p1886_p9 }
 0x28a   : > { %p1884_p8 = pneg %p1883_p7 }
 0x28b   : > { %p1890_p13 = por %p1889_p12, %p1888_p11 }
 0x28d   : > { %p1891_p0 = pnand %p1890_p13, %p1884_p8 }
 0x28f   : > { %1894 = shalt.err (!%p1891_p0)
}
 0x290   : > { %1825 = dma.vmem_to_hbm [thread:$0]  (%p2011_p5), %s2587_s6, 16, %s2585_s9, %s1421_s14  }
 0x291 PF: > { %p1831_p1 = scmp.ge.s32.totalorder %s1929_s29, 2  ;;  %s1445_s25 = sand.u32 1, %s1917_s26  }
 0x292   : > { %s1446_s10 = scalar_lea.sflag [#allocation4], %s1445_s25 }
 0x293   : > { %p1828_p2 = pnand %p1831_p1, %p2015_p6 }
 0x295   : > { %1912 = dma.done.wait (!%p1828_p2), %s1446_s10, 16  }
 0x296   : > { %1914 = vsyncadd (!%p1828_p2), %s1446_s10, 4294967280  ;;  %p19_p3 = scmp.ge.s32.totalorder %s1999_s8, 4   ;;  %s2639_s26 = smov %s1921_s27 }
 0x297   : > { %s2640_s27 = smov %s1925_s28  ;;  %s2641_s28 = smov %s2009_s11 }
 0x298   : > { %s2642_s29 = smov %s1999_s8  ;;  %21 = sbr.rel (!%p19_p3) target bundleno = 6 (0x6), region = 83 }
 0x29f   :  { %1450 = vsyncpa [#allocation4], 1 }
 0x2a0   :  { %1452 = vsyncpa [#allocation4 + $0x1], 1 }

</bundles_post_ra>
